<compile_context>
chip_gen: v7x
topology: tpu7x:2x2x1
jax: 0.10.0
libtpu: 0.0.40
codegen_flags: <defaults>
</compile_context>

<pallas_src>
import jax
import jax.numpy as jnp
from jax.experimental import pallas as pl
from jax.experimental.pallas import tpu as pltpu


IN_FEATURES = 768     # fixed by the PyTorch module: GraphConvLayer(768, 200)
OUT_FEATURES = 200
LANE = 128
SUBLANE = 8
MAX_NODE_TILE = 512   # 512 * 768 * 4 B = 1.5 MiB per bert_enc block (x2 double-buffer)


def _round_up(x, m):
    return (x + m - 1) // m * m


def _pick_node_tile(n):
    """Largest node tile <= MAX_NODE_TILE that tiles N cleanly (multiple of 8),
    falling back to the full N (block == full array dim is always legal)."""
    if n <= MAX_NODE_TILE:
        return n
    for t in (512, 256, 128, 64, 32, 16, 8):
        if n % t == 0:
            return t
    return n   # ragged N: keep it as one VMEM-resident tile


# ----------------------------- fused kernel --------------------------------


def _gcn_fused_kernel(x_ref, adj0_ref, w_ref, b_ref, o_ref, xr_acc):
    """One (batch b, node-tile k) grid step of the whole forward pass.

    x_ref:    (1, nt, F)   bert_enc tile (f32 or bf16)
    adj0_ref: (1, nt, 1)   adj[b, 0, k*nt:(k+1)*nt] as a column
    w_ref:    (F, Hp)      Linear weight stored as (in, out) == W_pt.T, lane-padded
    b_ref:    (1, Hp)      bias, lane-padded
    o_ref:    (1, 1, Hp)   relu(adj_row0 . (x @ W) + b) for this batch element
    xr_acc:   (8, F) f32   accumulator for sum_j adj[b,0,j] * x[b,j,:]
                           (8 identical rows: pads M to one sublane tile for the MXU)
    """
    k = pl.program_id(1)

    @pl.when(k == 0)
    def _():
        xr_acc[...] = jnp.zeros_like(xr_acc)

    # (1) Aggregate this node tile with adjacency row 0: exact f32 VPU multiply
    #     + cross-sublane reduce.  O(N*F) instead of the O(N*F*H) matmul the
    #     original op order would need.
    x = x_ref[0].astype(jnp.float32)          # (nt, F)
    a = adj0_ref[0].astype(jnp.float32)       # (nt, 1)  -> lane-broadcast over F
    xr_acc[...] += jnp.sum(a * x, axis=0, keepdims=True)   # broadcasts into all 8 rows

    # (2) Last node tile: tiny f32 MXU matmul, bias, ReLU, one lane-dense
    #     256-wide store of the single surviving row.
    @pl.when(k == pl.num_programs(1) - 1)
    def _():
        out = jnp.dot(xr_acc[...], w_ref[...],
                      preferred_element_type=jnp.float32)          # (8, Hp), rows identical
        o_ref[0] = jnp.maximum(out[0:1] + b_ref[...], 0.0).astype(o_ref.dtype)


# ----------------------------- wrappers ------------------------------------


def gcn_forward(bert_enc, adj, w_pad, b_pad):
    """GraphConvNetworks.forward: relu(bmm(adj, bert_enc @ W) + b)[:, 0, :]."""
    B, N, F = bert_enc.shape
    Hp = w_pad.shape[1]
    nt = _pick_node_tile(N)
    n_steps = N // nt

    # Only adjacency row 0 is ever used by the module output (exact: the row
    # slice commutes with the elementwise bias-add and ReLU).
    adj0 = adj[:, 0, :, None]                  # (B, N, 1)

    out_pad = pl.pallas_call(
        _gcn_fused_kernel,
        out_shape=jax.ShapeDtypeStruct((B, 1, Hp), jnp.float32),
        grid_spec=pltpu.PrefetchScalarGridSpec(
            num_scalar_prefetch=0,
            grid=(B, n_steps),                                       # reduction (nodes) last
            in_specs=[
                pl.BlockSpec((1, nt, F), lambda b, k: (b, k, 0)),    # bert_enc tile (pipelined)
                pl.BlockSpec((1, nt, 1), lambda b, k: (b, k, 0)),    # adj row-0 tile
                pl.BlockSpec((F, Hp), lambda b, k: (0, 0)),          # weight: VMEM-resident
                pl.BlockSpec((1, Hp), lambda b, k: (0, 0)),          # bias:   VMEM-resident
            ],
            out_specs=pl.BlockSpec((1, 1, Hp), lambda b, k: (b, 0, 0)),
            scratch_shapes=[pltpu.VMEM((SUBLANE, F), jnp.float32)],
        ),
        compiler_params=pltpu.CompilerParams(
            dimension_semantics=("parallel", "arbitrary")),
    )(bert_enc, adj0, w_pad, b_pad)

    return out_pad[:, 0, :OUT_FEATURES]        # drop lane padding -> (B, 200)


def init_params(key, in_features=IN_FEATURES, out_features=OUT_FEATURES):
    """Parameters matching the module (Linear(768, 200, bias=False) + zero bias),
    stored pre-padded to lane width 256 so the forward pass never re-pads."""
    bound = 1.0 / (in_features ** 0.5)         # ~ nn.Linear default init range
    w = jax.random.uniform(key, (in_features, out_features), jnp.float32,
                           minval=-bound, maxval=bound)   # stored as (in, out) == W_pt.T
    b = jnp.zeros((out_features,), jnp.float32)           # nn.Parameter(torch.zeros)
    hp = _round_up(out_features, LANE)
    w_pad = jnp.pad(w, ((0, 0), (0, hp - out_features)))  # zero columns beyond H
    b_pad = jnp.pad(b, (0, hp - out_features)).reshape(1, hp)
    return {"w": w_pad, "b": b_pad}


@jax.jit
def graph_conv_networks(params, bert_enc, adj):
    # ModuleList holds exactly one GraphConvLayer(768, 200); then obj_enc[:, 0, :].
    return gcn_forward(bert_enc, adj, params["w"], params["b"])


# ----------------------------- demo / check --------------------------------


if __name__ == "__main__":
    B, N = 2, 16

    key = jax.random.PRNGKey(0)
    key, kx, ka, kw = jax.random.split(key, 4)
    bert_enc = jax.random.normal(kx, (B, N, IN_FEATURES), jnp.float32)
    adj_raw = jax.random.uniform(ka, (B, N, N), jnp.float32)
    adj = adj_raw / jnp.sum(adj_raw, axis=-1, keepdims=True)   # row-normalized adjacency

    params = init_params(kw)

    out = graph_conv_networks(params, bert_enc, adj)
    jax.block_until_ready(out)
    assert out.shape == (B, OUT_FEATURES), out.shape

    # Pure-JAX f32 reference (same math / op order as the PyTorch module).
    w_full = params["w"][:, :OUT_FEATURES]
    b_full = params["b"][0, :OUT_FEATURES]
    support = jnp.einsum("bnf,fh->bnh", bert_enc, w_full)
    full = jnp.maximum(jnp.einsum("bij,bjh->bih", adj, support) + b_full, 0.0)
    ref = full[:, 0, :]
    err = float(jnp.max(jnp.abs(out - ref)))
    # Entire kernel is f32 now (aggregate-then-project reorder is exact);
    # only reduction-order rounding remains.
    assert err < 1e-3, f"max abs err {err}"

    print("KERNEL_OK")
</pallas_src>

<mosaic_0001>
module attributes {stable_mosaic.version = 11 : i64} {
  func.func @_gcn_fused_kernel(%arg0: i32, %arg1: i32, %arg2: memref<1x16x768xf32, #tpu.memory_space<vmem>>, %arg3: memref<1x16x1xf32, #tpu.memory_space<vmem>>, %arg4: memref<768x256xf32, #tpu.memory_space<vmem>>, %arg5: memref<1x256xf32, #tpu.memory_space<vmem>>, %arg6: memref<1x1x256xf32, #tpu.memory_space<vmem>>, %arg7: memref<8x768xf32, #tpu.memory_space<vmem>>) attributes {dimension_semantics = [#tpu.dimension_semantics<parallel>, #tpu.dimension_semantics<arbitrary>], iteration_bounds = array<i64: 2, 1>, scalar_prefetch = 0 : i64, scratch_operands = 1 : i64, tpu.core_type = #tpu.core_type<tc>, window_params = [{transform_indices = @transform_0, window_bounds = array<i64: 1, 16, 768>}, {transform_indices = @transform_1, window_bounds = array<i64: 1, 16, 1>}, {pipeline_mode = #tpu.pipeline_mode<synchronous>, transform_indices = @transform_2, window_bounds = array<i64: 768, 256>}, {pipeline_mode = #tpu.pipeline_mode<synchronous>, transform_indices = @transform_3, window_bounds = array<i64: 1, 256>}, {transform_indices = @transform_4, window_bounds = array<i64: 1, 1, 256>}]} {
    %c0_i32 = arith.constant 0 : i32
    %0 = arith.cmpi eq, %arg1, %c0_i32 : i32
    %1 = arith.extui %0 : i1 to i32
    %c0_i32_0 = arith.constant 0 : i32
    %2 = arith.cmpi ne, %1, %c0_i32_0 : i32
    scf.if %2 {
      %cst_12 = arith.constant 0.000000e+00 : f32
      %18 = vector.broadcast %cst_12 : f32 to vector<8x768xf32>
      %c0_13 = arith.constant 0 : index
      %c0_14 = arith.constant 0 : index
      %19 = vector.load %arg7[%c0_13, %c0_14] : memref<8x768xf32, #tpu.memory_space<vmem>>, vector<8x768xf32>
      tpu.vector_store %arg7[%c0_13, %c0_14], %18 {strides = array<i32>} : memref<8x768xf32, #tpu.memory_space<vmem>>, vector<8x768xf32>,
    } else {
    }
    %c0 = arith.constant 0 : index
    %c0_1 = arith.constant 0 : index
    %c0_2 = arith.constant 0 : index
    %3 = vector.load %arg2[%c0, %c0_1, %c0_2] : memref<1x16x768xf32, #tpu.memory_space<vmem>>, vector<1x16x768xf32>
    %4 = vector.shape_cast %3 : vector<1x16x768xf32> to vector<16x768xf32>
    %c0_3 = arith.constant 0 : index
    %c0_4 = arith.constant 0 : index
    %c0_5 = arith.constant 0 : index
    %5 = vector.load %arg3[%c0_3, %c0_4, %c0_5] : memref<1x16x1xf32, #tpu.memory_space<vmem>>, vector<1x16x1xf32>
    %6 = vector.shape_cast %5 : vector<1x16x1xf32> to vector<16x1xf32>
    %c0_6 = arith.constant 0 : index
    %c0_7 = arith.constant 0 : index
    %7 = vector.load %arg7[%c0_6, %c0_7] : memref<8x768xf32, #tpu.memory_space<vmem>>, vector<8x768xf32>
    %8 = vector.broadcast %6 : vector<16x1xf32> to vector<16x768xf32>
    %9 = arith.mulf %8, %4 : vector<16x768xf32>
    %cst = arith.constant dense<0.000000e+00> : vector<768xf32>
    %10 = vector.multi_reduction <add>, %9, %cst [0] : vector<16x768xf32> to vector<768xf32>
    %11 = vector.shape_cast %10 : vector<768xf32> to vector<1x768xf32>
    %12 = vector.broadcast %11 : vector<1x768xf32> to vector<8x768xf32>
    %13 = arith.addf %7, %12 : vector<8x768xf32>
    %c0_8 = arith.constant 0 : index
    %c0_9 = arith.constant 0 : index
    %14 = vector.load %arg7[%c0_8, %c0_9] : memref<8x768xf32, #tpu.memory_space<vmem>>, vector<8x768xf32>
    tpu.vector_store %arg7[%c0_8, %c0_9], %13 {strides = array<i32>} : memref<8x768xf32, #tpu.memory_space<vmem>>, vector<8x768xf32>,
    %c0_i32_10 = arith.constant 0 : i32
    %15 = arith.cmpi eq, %arg1, %c0_i32_10 : i32
    %16 = arith.extui %15 : i1 to i32
    %c0_i32_11 = arith.constant 0 : i32
    %17 = arith.cmpi ne, %16, %c0_i32_11 : i32
    scf.if %17 {
      %c0_12 = arith.constant 0 : index
      %c0_13 = arith.constant 0 : index
      %18 = vector.load %arg7[%c0_12, %c0_13] : memref<8x768xf32, #tpu.memory_space<vmem>>, vector<8x768xf32>
      %c0_14 = arith.constant 0 : index
      %c0_15 = arith.constant 0 : index
      %19 = vector.load %arg4[%c0_14, %c0_15] : memref<768x256xf32, #tpu.memory_space<vmem>>, vector<768x256xf32>
      %cst_16 = arith.constant dense<0.000000e+00> : vector<8x256xf32>
      %20 = tpu.matmul %18, %19, %cst_16 {dimension_numbers = #tpu.dot_dimension_numbers<[1], [0], [0], [1], [0, 0, 1, 1], [], []>} : vector<8x768xf32>, vector<768x256xf32>, vector<8x256xf32> -> vector<8x256xf32>
      %21 = vector.extract_strided_slice %20 {offsets = [0, 0], sizes = [1, 256], strides = [1, 1]} : vector<8x256xf32> to vector<1x256xf32>
      %c0_17 = arith.constant 0 : index
      %c0_18 = arith.constant 0 : index
      %22 = vector.load %arg5[%c0_17, %c0_18] : memref<1x256xf32, #tpu.memory_space<vmem>>, vector<1x256xf32>
      %23 = arith.addf %21, %22 : vector<1x256xf32>
      %cst_19 = arith.constant 0.000000e+00 : f32
      %24 = vector.broadcast %cst_19 : f32 to vector<1x256xf32>
      %25 = arith.maximumf %23, %24 : vector<1x256xf32>
      %c0_20 = arith.constant 0 : index
      %c0_21 = arith.constant 0 : index
      %c0_22 = arith.constant 0 : index
      %26 = vector.load %arg6[%c0_20, %c0_21, %c0_22] : memref<1x1x256xf32, #tpu.memory_space<vmem>>, vector<1x1x256xf32>
      %27 = vector.shape_cast %26 : vector<1x1x256xf32> to vector<1x256xf32>
      %28 = vector.shape_cast %25 : vector<1x256xf32> to vector<1x1x256xf32>
      tpu.vector_store %arg6[%c0_20, %c0_21, %c0_22], %28 {strides = array<i32>} : memref<1x1x256xf32, #tpu.memory_space<vmem>>, vector<1x1x256xf32>,
    } else {
    }
    return
  }
  func.func @transform_0(%arg0: i32, %arg1: i32) -> (i32, i32, i32) {
    %c0_i32 = arith.constant 0 : i32
    %c0_i32_0 = arith.constant 0 : i32
    return %arg0, %arg1, %c0_i32 : i32, i32, i32
  }
  func.func @transform_1(%arg0: i32, %arg1: i32) -> (i32, i32, i32) {
    %c0_i32 = arith.constant 0 : i32
    %c0_i32_0 = arith.constant 0 : i32
    return %arg0, %arg1, %c0_i32 : i32, i32, i32
  }
  func.func @transform_2(%arg0: i32, %arg1: i32) -> (i32, i32) {
    %c0_i32 = arith.constant 0 : i32
    %c0_i32_0 = arith.constant 0 : i32
    %c0_i32_1 = arith.constant 0 : i32
    return %c0_i32, %c0_i32_0 : i32, i32
  }
  func.func @transform_3(%arg0: i32, %arg1: i32) -> (i32, i32) {
    %c0_i32 = arith.constant 0 : i32
    %c0_i32_0 = arith.constant 0 : i32
    %c0_i32_1 = arith.constant 0 : i32
    return %c0_i32, %c0_i32_0 : i32, i32
  }
  func.func @transform_4(%arg0: i32, %arg1: i32) -> (i32, i32, i32) {
    %c0_i32 = arith.constant 0 : i32
    %c0_i32_0 = arith.constant 0 : i32
    %c0_i32_1 = arith.constant 0 : i32
    return %arg0, %c0_i32, %c0_i32_0 : i32, i32, i32
  }
}

</mosaic_0001>

<bundles_post_ra>
// kernel: graph_conv_networks.1
= control target key start
LH: loop header
LB: loop body
LE: loop exit
PB: predicated region body
PF: predicated region fallthrough
CT: control target
= control target key end

     0   :  { %9 = vsyncpa [#allocation4], 0  ;;  %s1567_s0 = inlined_call_operand.hbm [shape: f32[2,16,768], index: 0, kind: input, shape index: {}]   ;;  %s1568_s1 = inlined_call_operand.vmem [shape: f32[2,16,1], index: 1, kind: input, shape index: {}]   ;;  %s1569_s2 = inlined_call_operand.hbm [shape: f32[768,256], index: 2, kind: input, shape index: {}]   ;;  %s1570_s3 = inlined_call_operand.vmem [shape: f32[1,256], index: 3, kind: input, shape index: {}]   ;;  %s1571_s4 = inlined_call_operand.vmem [shape: f32[2,1,256], index: 4, kind: output, shape index: {}]  }
   0x1   :  { %11 = vsyncpa [#allocation4 + $0x1], 0 }
   0x2   :  { %12 = vsyncpa [#allocation6], 0  ;;  %s1381_s15 = smov 0   ;;  %s1383_s16 = smov 0  }
   0x3   :  { %s1385_s17 = smov 0   ;;  %s1387_s18 = smov 0  }
   0x4   :  { %s1389_s19 = smov 0   ;;  %s1391_s20 = smov 0  }
   0x5 LB: > { %s948_s21 = sadd.s32 4294967295, %s1346_s20   ;;  %p52_p0 = scmp.ne.s32.totalorder %s1330_s16, %s1326_s15  ;;  %s1346_s20 = sphi %s1391_s20, %s18_s20   ;;  %s1342_s19 = sphi %s1389_s19, %s1588_s19   ;;  %s1338_s18 = sphi %s1387_s18, %s1587_s18   ;;  %s1334_s17 = sphi %s1385_s17, %s1586_s17   ;;  %s1330_s16 = sphi %s1383_s16, %s1585_s16   ;;  %s1326_s15 = sphi %s1381_s15, %s1584_s15  }
   0x6   : > { %p1411_p1 = scmp.eq.s32.totalorder %s948_s21, 0  ;;  %p950_p2 = scmp.ge.s32.totalorder %s1346_s20, 1 }
   0x7   : > { %p159_p3 = scmp.lt.s32.totalorder %s1346_s20, 3  ;;  %s1348_s25 = smov [#allocation5]  }
   0x8   : > { %s1576_s22 = scalar_select %p1411_p1, 1, 0 }
   0x9   : > { %p1419_p4 = por %p1411_p1, %p52_p0  ;;  %p1423_p5 = pnand %p950_p2, %p159_p3 }
   0xa   : > { %s171_s26 = sshll.u32 %s1348_s25, 4  ;;  %s30_s28 = sadd.s32 1, %s1342_s19  ;;  %s172_s26 = int_to_ptr.vmem [resolvable:$true] %s171_s26 }
   0xb   : > { %s1577_s23 = scalar_select %p1419_p4, 1, 0 }
   0xc   : > { %s1578_s24 = scalar_select %p1423_p5, 1, 0 }
   0xd   : > { %p1167_p6 = pneg %p1423_p5  ;;  %s1234_s5 = scalar_lea.hbm %s1569_s2, 24576 }
   0xe   : > { %p1235_p8 = scmp.ne.s32.totalorder %s1569_s2, %s1234_s5  ;;  %p1241_p12 = scmp.lt.u32.totalorder %s1234_s5, %s1569_s2 }
   0xf   : > { %p1431_p7 = pnand %p1167_p6, %p1411_p1 }
  0x11   : > { %p1236_p9 = pneg %p1431_p7 }
  0x13   : > { %p1237_p10 = pnand %p1236_p9, %p1235_p8 }
  0x15   : > { %p1238_p11 = pneg %p1237_p10 }
  0x17   : > { %p1243_p13 = pnand %p1241_p12, %p1238_p11 }
  0x19   : > { %1246 = shalt.err (!%p1243_p13)
}
  0x1a   : > { %s1247_s10 = scalar_lea.vmem %s172_s26, 24576  ;;  %p1255_p6 = scmp.lt.s32.totalorder %s172_s26, %s172_s26 }
  0x1b   : > { %p1248_p0 = scmp.ne.s32.totalorder %s172_s26, %s1247_s10  ;;  %p1256_p1 = scmp.lt.s32.totalorder %s1247_s10, %s1247_s10 }
  0x1d   : > { %p1250_p2 = pnand %p1248_p0, %p1236_p9  ;;  %p1257_p4 = por %p1256_p1, %p1255_p6 }
  0x1f   : > { %p1251_p3 = pneg %p1250_p2 }
  0x21   : > { %p1258_p5 = pnand %p1257_p4, %p1251_p3 }
  0x23   : > { %1261 = shalt.err (!%p1258_p5)
}
  0x24   : > { %s1349_s11 = smov 256   ;;  %s1350_s12 = smov 16  }
  0x25   : > { %1170 = dma.hbm_to_vmem [thread:$0]  (!%p1431_p7), %s1569_s2, 24576, %s172_s26, [#allocation6], %s1349_s11, %s1349_s11, %s1350_s12  }
  0x26   : > { %p32_p1 = scmp.ge.s32.totalorder %s30_s28, 2  ;;  %s39_s15 = sadd.s32 1, %s1334_s17 }
  0x27   : > { %p46_p4 = scmp.ne.s32.totalorder %s1334_s17, %s1330_s16  ;;  %p47_p5 = scmp.eq.s32.totalorder %s1346_s20, 0 }
  0x28   : > { %s1590_s28 = smov (%p32_p1, %s30_s28), 0  ;;  %p1176_p9 = scmp.lt.s32.totalorder %s1346_s20, 2 }
  0x29   : > { %p48_p8 = por %p47_p5, %p46_p4  ;;  %s34_s21 = ssub.s32 %s1342_s19, %s1590_s28 }
  0x2a   : > { %s188_s25 = sand.u32 1, %s1334_s17   ;;  %p37_p10 = scmp.eq.s32.totalorder %s34_s21, 0 }
  0x2b   : > { %s1158_s29 = smul.u32 96, %s188_s25  ;;  %p1462_p11 = pnand %p1176_p9, %p48_p8 }
  0x2c   : > { %s1467_s26 = scalar_select %p37_p10, %s1334_s17, %s39_s15  }
  0x2d   : > { %s1159_s27 = smul.u32 1536, %s1342_s19  ;;  %s192_s5 = scalar_lea.vmem [#allocation3], %s1158_s29 }
  0x2e   : > { %s202_s6 = sshll.u32 %s192_s5, 4  ;;  %s1477_s10 = scalar_lea.sflag [#allocation4], %s188_s25  ;;  %s1475_s6 = int_to_ptr.vmem [resolvable:$true] %s202_s6 }
  0x2f   : > { %s1473_s9 = scalar_lea.hbm %s1567_s0, %s1159_s27  ;;  %p1264_p12 = pneg %p1462_p11 }
  0x30   : > { %s1262_s11 = scalar_lea.hbm %s1473_s9, 1536  ;;  %s1267_s14 = scalar_lea.hbm %s1567_s0, 3072 }
  0x31   : > { %p1263_p7 = scmp.ne.s32.totalorder %s1473_s9, %s1262_s11  ;;  %p1268_p2 = scmp.lt.u32.totalorder %s1473_s9, %s1567_s0 }
  0x32   : > { %p1269_p3 = scmp.lt.u32.totalorder %s1267_s14, %s1262_s11  ;;  %p1271_p1 = scmp.lt.u32.totalorder %s1262_s11, %s1473_s9 }
  0x33   : > { %p1265_p13 = pnand %p1264_p12, %p1263_p7 }
  0x34   : > { %p1270_p6 = por %p1269_p3, %p1268_p2 }
  0x35   : > { %p1266_p0 = pneg %p1265_p13 }
  0x36   : > { %p1272_p4 = por %p1271_p1, %p1270_p6 }
  0x38   : > { %p1273_p5 = pnand %p1272_p4, %p1266_p0 }
  0x3a   : > { %1276 = shalt.err (!%p1273_p5)
}
  0x3b   : > { %s1277_s25 = scalar_lea.vmem %s1475_s6, 1536  ;;  %s1351_s29 = smov [#allocation3]  }
  0x3c   : > { %p1278_p8 = scmp.ne.s32.totalorder %s1475_s6, %s1277_s25  ;;  %s1282_s27 = sshll.u32 %s1351_s29, 4  ;;  %s1283_s27 = int_to_ptr.vmem [resolvable:$false] %s1282_s27 }
  0x3d   : > { %s1284_s5 = scalar_lea.vmem %s1283_s27, 3072  ;;  %p1285_p7 = scmp.lt.s32.totalorder %s1475_s6, %s1283_s27 }
  0x3e   : > { %p1280_p9 = pnand %p1278_p8, %p1264_p12  ;;  %p1286_p13 = scmp.lt.s32.totalorder %s1284_s5, %s1277_s25 }
  0x40   : > { %p1281_p10 = pneg %p1280_p9  ;;  %p1287_p2 = por %p1286_p13, %p1285_p7 }
  0x42   : > { %p1288_p3 = pnand %p1287_p2, %p1281_p10 }
  0x44   : > { %1291 = shalt.err (!%p1288_p3)
}
  0x45   : > { %s1352_s7 = smov 768   ;;  %s1353_s8 = smov 48  }
  0x46   : > { %1174 = dma.hbm_to_vmem [thread:$0]  (!%p1462_p11), %s1473_s9, 1536, %s1475_s6, %s1477_s10, %s1352_s7, %s1352_s7, %s1353_s8  }
  0x47   : > { %p1581_p12 = scmp.ne.s32.totalorder %s1578_s24, 0 }
  0x48   : > { %s229_s11 = sand.u32 (!%p1581_p12), 1, %s1330_s16   ;;  %p1582_p0 = scmp.ne.s32.totalorder (!%p1581_p12), %s1577_s23, 0 }
  0x49   : > { %227 = sbr.rel (%p1581_p12) target bundleno = 530 (0x212), region = 36  ;;  %s230_s13 = scalar_lea.sflag (!%p1581_p12), [#allocation4], %s229_s11 }
  0x4a   : > { %s1160_s12 = smul.u32 (!%p1581_p12), 96, %s229_s11 }
  0x4c   : > { %s1508_s14 = scalar_lea.vmem (!%p1581_p12), [#allocation3], %s1160_s12 }
  0x50   : > { %1317 = dma.done.wait (%p1582_p0), %s230_s13, 1536  }
  0x51   : > { %1319 = vsyncadd (%p1582_p0), %s230_s13, 4294965760  ;;  %p1583_p6 = scmp.ne.s32.totalorder %s1576_s22, 0 }
  0x53   : > { %1321 = dma.done.wait (%p1583_p6), [#allocation6], 24576  }
  0x54   : > { %1323 = vsyncadd (%p1583_p6), [#allocation6], 4294942720  ;;  %p272_p11 = scmp.lt.s32.totalorder %s1338_s18, 1  ;;  %v1354_v0 = vmov 0   ;;  %v465_v3 = vld [vmem:[#allocation5 + $0x208] sm:$0xff]  ;;  %v467_v4 = vld [vmem:[#allocation5 + $0x218] sm:$0xff] }
  0x55   : > { %1233 = vset.pattern.permute.xlu0 %v1354_v0  ;;  %v401_v5 = vld [vmem:[#allocation5 + $0x8] sm:$0xff]  ;;  %v403_v6 = vld [vmem:[#allocation5 + $0x18] sm:$0xff]  ;;  %v1026_v7 = vpack.c.bf16 %v467_v4, %v465_v3  ;;  %v464_v9 = vld [vmem:[#allocation5 + $0x200] sm:$0xff] }
  0x56   : > { %s1592_s18 = smov (!%p272_p11, %s1338_s18), 1  ;;  %v962_v8 = vpack.c.bf16 %v403_v6, %v401_v5  ;;  %v466_v10 = vld [vmem:[#allocation5 + $0x210] sm:$0xff]  ;;  %v400_v11 = vld [vmem:[#allocation5] sm:$0xff]  ;;  %v469_v14 = vld [vmem:[#allocation5 + $0x228] sm:$0xff] }
  0x57   : > { %s961_s24 = sshll.u32 %s1592_s18, 4  ;;  %v1028_v12 = vpack.c.bf16 %v466_v10, %v464_v9  ;;  %v402_v13 = vld [vmem:[#allocation5 + $0x10] sm:$0xff]  ;;  %v471_v15 = vld [vmem:[#allocation5 + $0x238] sm:$0xff]  ;;  %1027 = vmatprep.subr.bf16.mxu0 %v1026_v7  ;;  %v405_v18 = vld [vmem:[#allocation5 + $0x28] sm:$0xff]  ;;  %s958_s10 = sshll.u32 %s1592_s18, 1 }
  0x58   : > { %s279_s23 = scalar_lea.vmem %s1568_s1, %s961_s24  ;;  %963 = vmatprep.subr.bf16.mxu1 %v962_v8  ;;  %v964_v16 = vpack.c.bf16 %v402_v13, %v400_v11  ;;  %v1030_v17 = vpack.c.bf16 %v471_v15, %v469_v14  ;;  %v407_v19 = vld [vmem:[#allocation5 + $0x38] sm:$0xff]  ;;  %v468_v20 = vld [vmem:[#allocation5 + $0x220] sm:$0xff]  ;;  %v470_v22 = vld [vmem:[#allocation5 + $0x230] sm:$0xff]  ;;  %s284_s25 = scalar_lea.vmem %s1571_s4, %s958_s10 }
  0x59   : > { %v307_v1 = vld [vmem:[%s279_s23] sm:$0xff]  ;;  %v308_v2 = vld [vmem:[%s279_s23 + $0x8] sm:$0xff]  ;;  %1029 = vmatpush1.bf16.msra.mxu0 %v1028_v12  ;;  %v966_v21 = vpack.c.bf16 %v407_v19, %v405_v18  ;;  %v406_v24 = vld [vmem:[#allocation5 + $0x30] sm:$0xff]  ;;  %v1032_v25 = vpack.c.bf16 %v470_v22, %v468_v20 }
  0x5a   : > { %317 = vperm.xlu0 %1233, %v307_v1   ;;  %v404_v23 = vld [vmem:[#allocation5 + $0x20] sm:$0xff]  ;;  %965 = vmatpush1.bf16.msra.mxu1 %v964_v16  ;;  %v473_v27 = vld [vmem:[#allocation5 + $0x248] sm:$0xff]  ;;  %v475_v28 = vld [vmem:[#allocation5 + $0x258] sm:$0xff] }
  0x5b   : > { %1031 = vmatprep.subr.bf16.mxu0 %v1030_v17  ;;  %v968_v26 = vpack.c.bf16 %v406_v24, %v404_v23  ;;  %v409_v29 = vld [vmem:[#allocation5 + $0x48] sm:$0xff]  ;;  %967 = vmatprep.subr.bf16.mxu1 %v966_v21  ;;  %v1034_v30 = vpack.c.bf16 %v475_v28, %v473_v27  ;;  %v411_v31 = vld [vmem:[#allocation5 + $0x58] sm:$0xff]  ;;  %v472_v32 = vld [vmem:[#allocation5 + $0x240] sm:$0xff] }
  0x5c   : > { %v474_v33 = vld [vmem:[#allocation5 + $0x250] sm:$0xff]  ;;  %v970_v34 = vpack.c.bf16 %v411_v31, %v409_v29  ;;  %v408_v35 = vld [vmem:[#allocation5 + $0x40] sm:$0xff]  ;;  %v477_v37 = vld [vmem:[#allocation5 + $0x268] sm:$0xff] }
  0x5d   : > { %v410_v36 = vld [vmem:[#allocation5 + $0x50] sm:$0xff]  ;;  %1033 = vmatpush1.bf16.msra.mxu0 %v1032_v25  ;;  %v1036_v38 = vpack.c.bf16 %v474_v33, %v472_v32  ;;  %v479_v39 = vld [vmem:[#allocation5 + $0x278] sm:$0xff]  ;;  %v413_v40 = vld [vmem:[#allocation5 + $0x68] sm:$0xff] }
  0x5e   : > { %322 = vperm.xlu0 %1233, %v308_v2   ;;  %v415_v41 = vld [vmem:[#allocation5 + $0x78] sm:$0xff]  ;;  %969 = vmatpush1.bf16.msra.mxu1 %v968_v26  ;;  %v972_v42 = vpack.c.bf16 %v410_v36, %v408_v35  ;;  %v1038_v43 = vpack.c.bf16 %v479_v39, %v477_v37  ;;  %v476_v44 = vld [vmem:[#allocation5 + $0x260] sm:$0xff]  ;;  %v478_v45 = vld [vmem:[#allocation5 + $0x270] sm:$0xff] }
  0x5f   : > { %1035 = vmatprep.subr.bf16.mxu0 %v1034_v30  ;;  %v412_v46 = vld [vmem:[#allocation5 + $0x60] sm:$0xff]  ;;  %971 = vmatprep.subr.bf16.mxu1 %v970_v34  ;;  %v974_v47 = vpack.c.bf16 %v415_v41, %v413_v40  ;;  %v414_v48 = vld [vmem:[#allocation5 + $0x70] sm:$0xff]  ;;  %v481_v49 = vld [vmem:[#allocation5 + $0x288] sm:$0xff]  ;;  %v1040_v53 = vpack.c.bf16 %v478_v45, %v476_v44 }
  0x60   : > { %v483_v50 = vld [vmem:[#allocation5 + $0x298] sm:$0xff]  ;;  %v417_v51 = vld [vmem:[#allocation5 + $0x88] sm:$0xff]  ;;  %v976_v54 = vpack.c.bf16 %v414_v48, %v412_v46  ;;  %v480_v56 = vld [vmem:[#allocation5 + $0x280] sm:$0xff] }
  0x61   : > { %v419_v52 = vld [vmem:[#allocation5 + $0x98] sm:$0xff]  ;;  %1037 = vmatpush1.bf16.msra.mxu0 %v1036_v38  ;;  %v1042_v55 = vpack.c.bf16 %v483_v50, %v481_v49  ;;  %v482_v57 = vld [vmem:[#allocation5 + $0x290] sm:$0xff]  ;;  %v416_v58 = vld [vmem:[#allocation5 + $0x80] sm:$0xff] }
  0x62   : > { %973 = vmatpush1.bf16.msra.mxu1 %v972_v42  ;;  %1039 = vmatprep.subr.bf16.mxu0 %v1038_v43  ;;  %v978_v59 = vpack.c.bf16 %v419_v52, %v417_v51  ;;  %v418_v60 = vld [vmem:[#allocation5 + $0x90] sm:$0xff]  ;;  %v485_v61 = vld [vmem:[#allocation5 + $0x2a8] sm:$0xff]  ;;  %v487_v62 = vld [vmem:[#allocation5 + $0x2b8] sm:$0xff]  ;;  %v1044_v1 = vpack.c.bf16 %v482_v57, %v480_v56 }
  0x63   : > { %975 = vmatprep.subr.bf16.mxu1 %v974_v47  ;;  %v421_v63 = vld [vmem:[#allocation5 + $0xa8] sm:$0xff]  ;;  %v423_v0 = vld [vmem:[#allocation5 + $0xb8] sm:$0xff]  ;;  %v980_v2 = vpack.c.bf16 %v418_v60, %v416_v58  ;;  %v1046_v3 = vpack.c.bf16 %v487_v62, %v485_v61  ;;  %v484_v4 = vld [vmem:[#allocation5 + $0x2a0] sm:$0xff] }
  0x64   : > { %v486_v5 = vld [vmem:[#allocation5 + $0x2b0] sm:$0xff]  ;;  %v420_v6 = vld [vmem:[#allocation5 + $0xa0] sm:$0xff]  ;;  %v982_v7 = vpack.c.bf16 %v423_v0, %v421_v63  ;;  %v489_v9 = vld [vmem:[#allocation5 + $0x2c8] sm:$0xff] }
  0x65   : > { %1041 = vmatpush1.bf16.msra.mxu0 %v1040_v53  ;;  %v422_v8 = vld [vmem:[#allocation5 + $0xb0] sm:$0xff]  ;;  %v491_v10 = vld [vmem:[#allocation5 + $0x2d8] sm:$0xff]  ;;  %v425_v11 = vld [vmem:[#allocation5 + $0xc8] sm:$0xff]  ;;  %v1048_v13 = vpack.c.bf16 %v486_v5, %v484_v4 }
  0x66   : > { %977 = vmatpush1.bf16.msra.mxu1 %v976_v54  ;;  %1043 = vmatprep.subr.bf16.mxu0 %v1042_v55  ;;  %v427_v12 = vld [vmem:[#allocation5 + $0xd8] sm:$0xff]  ;;  %v984_v14 = vpack.c.bf16 %v422_v8, %v420_v6  ;;  %v1050_v15 = vpack.c.bf16 %v491_v10, %v489_v9  ;;  %v488_v16 = vld [vmem:[#allocation5 + $0x2c0] sm:$0xff]  ;;  %v490_v17 = vld [vmem:[#allocation5 + $0x2d0] sm:$0xff] }
  0x67   : > { %979 = vmatprep.subr.bf16.mxu1 %v978_v59  ;;  %v424_v18 = vld [vmem:[#allocation5 + $0xc0] sm:$0xff]  ;;  %v986_v19 = vpack.c.bf16 %v427_v12, %v425_v11  ;;  %v426_v20 = vld [vmem:[#allocation5 + $0xd0] sm:$0xff]  ;;  %v493_v21 = vld [vmem:[#allocation5 + $0x2e8] sm:$0xff]  ;;  %v1052_v25 = vpack.c.bf16 %v490_v17, %v488_v16 }
  0x68   : > { %v495_v22 = vld [vmem:[#allocation5 + $0x2f8] sm:$0xff]  ;;  %v429_v23 = vld [vmem:[#allocation5 + $0xe8] sm:$0xff]  ;;  %v988_v26 = vpack.c.bf16 %v426_v20, %v424_v18  ;;  %v492_v28 = vld [vmem:[#allocation5 + $0x2e0] sm:$0xff] }
  0x69   : > { %1045 = vmatpush1.bf16.msra.mxu0 %v1044_v1  ;;  %v431_v24 = vld [vmem:[#allocation5 + $0xf8] sm:$0xff]  ;;  %v1054_v27 = vpack.c.bf16 %v495_v22, %v493_v21  ;;  %v494_v29 = vld [vmem:[#allocation5 + $0x2f0] sm:$0xff]  ;;  %v428_v30 = vld [vmem:[#allocation5 + $0xe0] sm:$0xff] }
  0x6a   : > { %981 = vmatpush1.bf16.msra.mxu1 %v980_v2  ;;  %1047 = vmatprep.subr.bf16.mxu0 %v1046_v3  ;;  %v990_v31 = vpack.c.bf16 %v431_v24, %v429_v23  ;;  %v430_v32 = vld [vmem:[#allocation5 + $0xf0] sm:$0xff]  ;;  %v497_v33 = vld [vmem:[#allocation5 + $0x308] sm:$0xff]  ;;  %v499_v34 = vld [vmem:[#allocation5 + $0x318] sm:$0xff]  ;;  %v1056_v37 = vpack.c.bf16 %v494_v29, %v492_v28 }
  0x6b   : > { %983 = vmatprep.subr.bf16.mxu1 %v982_v7  ;;  %v433_v35 = vld [vmem:[#allocation5 + $0x108] sm:$0xff]  ;;  %v435_v36 = vld [vmem:[#allocation5 + $0x118] sm:$0xff]  ;;  %v992_v38 = vpack.c.bf16 %v430_v32, %v428_v30  ;;  %v1058_v39 = vpack.c.bf16 %v499_v34, %v497_v33  ;;  %v496_v40 = vld [vmem:[#allocation5 + $0x300] sm:$0xff] }
  0x6c   : > { %v498_v41 = vld [vmem:[#allocation5 + $0x310] sm:$0xff]  ;;  %v432_v42 = vld [vmem:[#allocation5 + $0x100] sm:$0xff]  ;;  %v994_v43 = vpack.c.bf16 %v435_v36, %v433_v35  ;;  %v501_v45 = vld [vmem:[#allocation5 + $0x328] sm:$0xff] }
  0x6d   : > { %1049 = vmatpush1.bf16.msra.mxu0 %v1048_v13  ;;  %v434_v44 = vld [vmem:[#allocation5 + $0x110] sm:$0xff]  ;;  %v503_v46 = vld [vmem:[#allocation5 + $0x338] sm:$0xff]  ;;  %v437_v47 = vld [vmem:[#allocation5 + $0x128] sm:$0xff]  ;;  %v1060_v49 = vpack.c.bf16 %v498_v41, %v496_v40 }
  0x6e   : > { %985 = vmatpush1.bf16.msra.mxu1 %v984_v14  ;;  %1051 = vmatprep.subr.bf16.mxu0 %v1050_v15  ;;  %v439_v48 = vld [vmem:[#allocation5 + $0x138] sm:$0xff]  ;;  %v996_v50 = vpack.c.bf16 %v434_v44, %v432_v42  ;;  %v1062_v51 = vpack.c.bf16 %v503_v46, %v501_v45  ;;  %v500_v52 = vld [vmem:[#allocation5 + $0x320] sm:$0xff]  ;;  %v502_v53 = vld [vmem:[#allocation5 + $0x330] sm:$0xff] }
  0x6f   : > { %987 = vmatprep.subr.bf16.mxu1 %v986_v19  ;;  %v436_v54 = vld [vmem:[#allocation5 + $0x120] sm:$0xff]  ;;  %v998_v55 = vpack.c.bf16 %v439_v48, %v437_v47  ;;  %v438_v56 = vld [vmem:[#allocation5 + $0x130] sm:$0xff]  ;;  %v505_v57 = vld [vmem:[#allocation5 + $0x348] sm:$0xff]  ;;  %v1064_v61 = vpack.c.bf16 %v502_v53, %v500_v52 }
  0x70   : > { %v507_v58 = vld [vmem:[#allocation5 + $0x358] sm:$0xff]  ;;  %v441_v59 = vld [vmem:[#allocation5 + $0x148] sm:$0xff]  ;;  %v1000_v62 = vpack.c.bf16 %v438_v56, %v436_v54  ;;  %v504_v0 = vld [vmem:[#allocation5 + $0x340] sm:$0xff] }
  0x71   : > { %1053 = vmatpush1.bf16.msra.mxu0 %v1052_v25  ;;  %v443_v60 = vld [vmem:[#allocation5 + $0x158] sm:$0xff]  ;;  %v1066_v63 = vpack.c.bf16 %v507_v58, %v505_v57  ;;  %v506_v1 = vld [vmem:[#allocation5 + $0x350] sm:$0xff]  ;;  %v440_v2 = vld [vmem:[#allocation5 + $0x140] sm:$0xff] }
  0x72   : > { %989 = vmatpush1.bf16.msra.mxu1 %v988_v26  ;;  %1055 = vmatprep.subr.bf16.mxu0 %v1054_v27  ;;  %v1002_v3 = vpack.c.bf16 %v443_v60, %v441_v59  ;;  %v442_v4 = vld [vmem:[#allocation5 + $0x150] sm:$0xff]  ;;  %v509_v5 = vld [vmem:[#allocation5 + $0x368] sm:$0xff]  ;;  %v511_v6 = vld [vmem:[#allocation5 + $0x378] sm:$0xff]  ;;  %v1068_v9 = vpack.c.bf16 %v506_v1, %v504_v0 }
  0x73   : > { %991 = vmatprep.subr.bf16.mxu1 %v990_v31  ;;  %v445_v7 = vld [vmem:[#allocation5 + $0x168] sm:$0xff]  ;;  %v447_v8 = vld [vmem:[#allocation5 + $0x178] sm:$0xff]  ;;  %v1004_v10 = vpack.c.bf16 %v442_v4, %v440_v2  ;;  %v1070_v11 = vpack.c.bf16 %v511_v6, %v509_v5  ;;  %v508_v12 = vld [vmem:[#allocation5 + $0x360] sm:$0xff] }
  0x74   : > { %v510_v13 = vld [vmem:[#allocation5 + $0x370] sm:$0xff]  ;;  %v444_v14 = vld [vmem:[#allocation5 + $0x160] sm:$0xff]  ;;  %v1006_v15 = vpack.c.bf16 %v447_v8, %v445_v7  ;;  %v513_v17 = vld [vmem:[#allocation5 + $0x388] sm:$0xff] }
  0x75   : > { %1057 = vmatpush1.bf16.msra.mxu0 %v1056_v37  ;;  %v446_v16 = vld [vmem:[#allocation5 + $0x170] sm:$0xff]  ;;  %v515_v18 = vld [vmem:[#allocation5 + $0x398] sm:$0xff]  ;;  %v449_v19 = vld [vmem:[#allocation5 + $0x188] sm:$0xff]  ;;  %v1072_v21 = vpack.c.bf16 %v510_v13, %v508_v12 }
  0x76   : > { %993 = vmatpush1.bf16.msra.mxu1 %v992_v38  ;;  %1059 = vmatprep.subr.bf16.mxu0 %v1058_v39  ;;  %v451_v20 = vld [vmem:[#allocation5 + $0x198] sm:$0xff]  ;;  %v1008_v22 = vpack.c.bf16 %v446_v16, %v444_v14  ;;  %v1074_v23 = vpack.c.bf16 %v515_v18, %v513_v17  ;;  %v512_v24 = vld [vmem:[#allocation5 + $0x380] sm:$0xff]  ;;  %v514_v25 = vld [vmem:[#allocation5 + $0x390] sm:$0xff] }
  0x77   : > { %995 = vmatprep.subr.bf16.mxu1 %v994_v43  ;;  %v448_v26 = vld [vmem:[#allocation5 + $0x180] sm:$0xff]  ;;  %v1010_v27 = vpack.c.bf16 %v451_v20, %v449_v19  ;;  %v450_v28 = vld [vmem:[#allocation5 + $0x190] sm:$0xff]  ;;  %v517_v29 = vld [vmem:[#allocation5 + $0x3a8] sm:$0xff]  ;;  %v1076_v33 = vpack.c.bf16 %v514_v25, %v512_v24 }
  0x78   : > { %v519_v30 = vld [vmem:[#allocation5 + $0x3b8] sm:$0xff]  ;;  %v453_v31 = vld [vmem:[#allocation5 + $0x1a8] sm:$0xff]  ;;  %v1012_v34 = vpack.c.bf16 %v450_v28, %v448_v26  ;;  %v516_v36 = vld [vmem:[#allocation5 + $0x3a0] sm:$0xff] }
  0x79   : > { %1061 = vmatpush1.bf16.msra.mxu0 %v1060_v49  ;;  %v455_v32 = vld [vmem:[#allocation5 + $0x1b8] sm:$0xff]  ;;  %v1078_v35 = vpack.c.bf16 %v519_v30, %v517_v29  ;;  %v518_v37 = vld [vmem:[#allocation5 + $0x3b0] sm:$0xff]  ;;  %v452_v38 = vld [vmem:[#allocation5 + $0x1a0] sm:$0xff] }
  0x7a   : > { %997 = vmatpush1.bf16.msra.mxu1 %v996_v50  ;;  %1063 = vmatprep.subr.bf16.mxu0 %v1062_v51  ;;  %v1014_v39 = vpack.c.bf16 %v455_v32, %v453_v31  ;;  %v454_v40 = vld [vmem:[#allocation5 + $0x1b0] sm:$0xff]  ;;  %v521_v41 = vld [vmem:[#allocation5 + $0x3c8] sm:$0xff]  ;;  %v523_v42 = vld [vmem:[#allocation5 + $0x3d8] sm:$0xff]  ;;  %v1080_v45 = vpack.c.bf16 %v518_v37, %v516_v36 }
  0x7b   : > { %999 = vmatprep.subr.bf16.mxu1 %v998_v55  ;;  %v457_v43 = vld [vmem:[#allocation5 + $0x1c8] sm:$0xff]  ;;  %v459_v44 = vld [vmem:[#allocation5 + $0x1d8] sm:$0xff]  ;;  %v1016_v46 = vpack.c.bf16 %v454_v40, %v452_v38  ;;  %v1082_v47 = vpack.c.bf16 %v523_v42, %v521_v41  ;;  %v520_v48 = vld [vmem:[#allocation5 + $0x3c0] sm:$0xff] }
  0x7c   : > { %v522_v49 = vld [vmem:[#allocation5 + $0x3d0] sm:$0xff]  ;;  %v456_v50 = vld [vmem:[#allocation5 + $0x1c0] sm:$0xff]  ;;  %v1018_v51 = vpack.c.bf16 %v459_v44, %v457_v43  ;;  %v525_v53 = vld [vmem:[#allocation5 + $0x3e8] sm:$0xff] }
  0x7d   : > { %1065 = vmatpush1.bf16.msra.mxu0 %v1064_v61  ;;  %v458_v52 = vld [vmem:[#allocation5 + $0x1d0] sm:$0xff]  ;;  %v527_v54 = vld [vmem:[#allocation5 + $0x3f8] sm:$0xff]  ;;  %v461_v55 = vld [vmem:[#allocation5 + $0x1e8] sm:$0xff]  ;;  %v1084_v57 = vpack.c.bf16 %v522_v49, %v520_v48 }
  0x7e   : > { %1001 = vmatpush1.bf16.msra.mxu1 %v1000_v62  ;;  %1067 = vmatprep.subr.bf16.mxu0 %v1066_v63  ;;  %v463_v56 = vld [vmem:[#allocation5 + $0x1f8] sm:$0xff]  ;;  %v1020_v58 = vpack.c.bf16 %v458_v52, %v456_v50  ;;  %v1086_v59 = vpack.c.bf16 %v527_v54, %v525_v53  ;;  %v524_v60 = vld [vmem:[#allocation5 + $0x3e0] sm:$0xff]  ;;  %v526_v61 = vld [vmem:[#allocation5 + $0x3f0] sm:$0xff] }
  0x7f   : > { %1003 = vmatprep.subr.bf16.mxu1 %v1002_v3  ;;  %v460_v62 = vld [vmem:[#allocation5 + $0x1e0] sm:$0xff]  ;;  %v1022_v63 = vpack.c.bf16 %v463_v56, %v461_v55  ;;  %v462_v0 = vld [vmem:[#allocation5 + $0x1f0] sm:$0xff]  ;;  %v529_v1 = vld [vmem:[#allocation5 + $0x408] sm:$0xff]  ;;  %v1088_v3 = vpack.c.bf16 %v526_v61, %v524_v60 }
  0x80   : > { %v531_v2 = vld [vmem:[#allocation5 + $0x418] sm:$0xff]  ;;  %v1024_v4 = vpack.c.bf16 %v462_v0, %v460_v62  ;;  %v295_v7 = vld [vmem:[%s1508_s14] sm:$0xff]  ;;  %v297_v8 = vld [vmem:[%s1508_s14 + $0x10] sm:$0xff] }
  0x81   : > { %1069 = vmatpush1.bf16.msra.mxu0 %v1068_v9  ;;  %v1090_v5 = vpack.c.bf16 %v531_v2, %v529_v1  ;;  %v299_v9 = vld [vmem:[%s1508_s14 + $0x20] sm:$0xff]  ;;  %v305_v13 = vld [vmem:[%s1508_s14 + $0x50] sm:$0xff]  ;;  %v306_v14 = vld [vmem:[%s1508_s14 + $0x58] sm:$0xff] }
  0x82   : > { %1005 = vmatpush1.bf16.msra.mxu1 %v1004_v10  ;;  %1071 = vmatprep.subr.bf16.mxu0 %v1070_v11  ;;  %v300_v10 = vld [vmem:[%s1508_s14 + $0x28] sm:$0xff]  ;;  %v301_v11 = vld [vmem:[%s1508_s14 + $0x30] sm:$0xff]  ;;  %v303_v12 = vld [vmem:[%s1508_s14 + $0x40] sm:$0xff] }
  0x83   : > { %1007 = vmatprep.subr.bf16.mxu1 %v1006_v15  ;;  %v296_v15 = vld [vmem:[%s1508_s14 + $0x8] sm:$0xff]  ;;  %v302_v16 = vld [vmem:[%s1508_s14 + $0x38] sm:$0xff]  ;;  %v528_v60 = vld [vmem:[#allocation5 + $0x400] sm:$0xff] }
  0x84   : > { %v298_v17 = vld [vmem:[%s1508_s14 + $0x18] sm:$0xff]  ;;  %v304_v18 = vld [vmem:[%s1508_s14 + $0x48] sm:$0xff]  ;;  %v530_v61 = vld [vmem:[#allocation5 + $0x410] sm:$0xff] }
  0x85   : > { %1073 = vmatpush1.bf16.msra.mxu0 %v1072_v21  ;;  %v533_v1 = vld [vmem:[#allocation5 + $0x428] sm:$0xff]  ;;  %v535_v2 = vld [vmem:[#allocation5 + $0x438] sm:$0xff] }
  0x86   : > { %1009 = vmatpush1.bf16.msra.mxu1 %v1008_v22  ;;  %1075 = vmatprep.subr.bf16.mxu0 %v1074_v23 }
  0x87   : > { %1011 = vmatprep.subr.bf16.mxu1 %v1010_v27 }
  0x89   : > { %1077 = vmatpush1.bf16.msra.mxu0 %v1076_v33 }
  0x8a   : > { %1013 = vmatpush1.bf16.msra.mxu1 %v1012_v34  ;;  %1079 = vmatprep.subr.bf16.mxu0 %v1078_v35 }
  0x8b   : > { %1015 = vmatprep.subr.bf16.mxu1 %v1014_v39 }
  0x8d   : > { %1081 = vmatpush1.bf16.msra.mxu0 %v1080_v45 }
  0x8e   : > { %1017 = vmatpush1.bf16.msra.mxu1 %v1016_v46  ;;  %1083 = vmatprep.subr.bf16.mxu0 %v1082_v47 }
  0x8f   : > { %1019 = vmatprep.subr.bf16.mxu1 %v1018_v51 }
  0x91   : > { %1085 = vmatpush1.bf16.msra.mxu0 %v1084_v57 }
  0x92   : > { %1021 = vmatpush1.bf16.msra.mxu1 %v1020_v58  ;;  %1087 = vmatprep.subr.bf16.mxu0 %v1086_v59 }
  0x93   : > { %1023 = vmatprep.subr.bf16.mxu1 %v1022_v63 }
  0x95   : > { %1089 = vmatpush1.bf16.msra.mxu0 %v1088_v3 }
  0x96   : > { %1025 = vmatpush1.bf16.msra.mxu1 %v1024_v4  ;;  %1091 = vmatprep.subr.bf16.mxu0 %v1090_v5 }
  0xd9   : > { %v318_v6 = vpop.permute.xlu0 %317 }
  0xda   : > { %v325_v19 = vmul.f32 %v318_v6, %v295_v7  ;;  %v327_v20 = vmul.f32 %v318_v6, %v297_v8  ;;  %v329_v21 = vmul.f32 %v318_v6, %v299_v9  ;;  %v330_v22 = vmul.f32 %v318_v6, %v300_v10  ;;  %v532_v9 = vld [vmem:[#allocation5 + $0x420] sm:$0xff]  ;;  %v534_v10 = vld [vmem:[#allocation5 + $0x430] sm:$0xff] }
  0xdb   : > { %v326_v28 = vmul.f32 %v318_v6, %v296_v15  ;;  %v328_v30 = vmul.f32 %v318_v6, %v298_v17  ;;  %v1092_v7 = vpack.c.bf16 %v530_v61, %v528_v60  ;;  %v1094_v8 = vpack.c.bf16 %v535_v2, %v533_v1  ;;  %v538_v17 = vld [vmem:[#allocation5 + $0x450] sm:$0xff]  ;;  %v569_v61 = vld [vmem:[#allocation5 + $0x548] sm:$0xff]  ;;  %v568_v1 = vld [vmem:[#allocation5 + $0x540] sm:$0xff] }
  0xdc   : > { %v566_v60 = vld [vmem:[#allocation5 + $0x530] sm:$0xff] }
  0xdd   : > { %v323_v23 = vpop.permute.xlu0 %322  ;;  %v570_v2 = vld [vmem:[#allocation5 + $0x550] sm:$0xff] }
  0xde   : > { %v331_v24 = vmul.f32 %v323_v23, %v301_v11  ;;  %v333_v25 = vmul.f32 %v323_v23, %v303_v12  ;;  %v335_v26 = vmul.f32 %v323_v23, %v305_v13  ;;  %v336_v27 = vmul.f32 %v323_v23, %v306_v14  ;;  %v537_v12 = vld [vmem:[#allocation5 + $0x448] sm:$0xff]  ;;  %v539_v13 = vld [vmem:[#allocation5 + $0x458] sm:$0xff] }
  0xdf   : > { %v332_v29 = vmul.f32 %v323_v23, %v302_v16  ;;  %v334_v31 = vmul.f32 %v323_v23, %v304_v18  ;;  %v1096_v14 = vpack.c.bf16 %v534_v10, %v532_v9  ;;  %v1098_v15 = vpack.c.bf16 %v539_v13, %v537_v12  ;;  %v536_v16 = vld [vmem:[#allocation5 + $0x440] sm:$0xff]  ;;  %v541_v18 = vld [vmem:[#allocation5 + $0x468] sm:$0xff]  ;;  %v542_v23 = vld [vmem:[#allocation5 + $0x470] sm:$0xff] }
  0xe0   : > { %v1538_v32 = vadd.f32 %v335_v26, %v329_v21  ;;  %v337_v33 = vadd.f32 %v331_v24, %v325_v19  ;;  %v351_v34 = vadd.f32 %v333_v25, %v327_v20  ;;  %v372_v35 = vadd.f32 %v336_v27, %v330_v22  ;;  %v543_v19 = vld [vmem:[#allocation5 + $0x478] sm:$0xff]  ;;  %v540_v22 = vld [vmem:[#allocation5 + $0x460] sm:$0xff]  ;;  %v545_v24 = vld [vmem:[#allocation5 + $0x488] sm:$0xff] }
  0xe1   : > { %v344_v36 = vadd.f32 %v332_v29, %v326_v28  ;;  %v358_v37 = vadd.f32 %v334_v31, %v328_v30  ;;  %v1100_v20 = vpack.c.bf16 %v538_v17, %v536_v16  ;;  %v1102_v21 = vpack.c.bf16 %v543_v19, %v541_v18  ;;  %v547_v25 = vld [vmem:[#allocation5 + $0x498] sm:$0xff]  ;;  %v544_v28 = vld [vmem:[#allocation5 + $0x480] sm:$0xff]  ;;  %v546_v29 = vld [vmem:[#allocation5 + $0x490] sm:$0xff] }
  0xe2   : > { %v338_v38 = vrot.slane %v337_v33, 4  ;;  %v352_v39 = vrot.slane %v351_v34, 4  ;;  %v373_v40 = vrot.slane %v372_v35, 4  ;;  %v1104_v26 = vpack.c.bf16 %v542_v23, %v540_v22  ;;  %v549_v30 = vld [vmem:[#allocation5 + $0x4a8] sm:$0xff]  ;;  %v551_v31 = vld [vmem:[#allocation5 + $0x4b8] sm:$0xff] }
  0xe3   : > { %v345_v41 = vrot.slane %v344_v36, 4  ;;  %v359_v42 = vrot.slane %v358_v37, 4  ;;  %v1106_v27 = vpack.c.bf16 %v547_v25, %v545_v24  ;;  %v577_v9 = vld [vmem:[#allocation5 + $0x588] sm:$0xff]  ;;  %v579_v10 = vld [vmem:[#allocation5 + $0x598] sm:$0xff]  ;;  %v366_v12 = vrot.slane %v1538_v32, 4 }
  0xe4   : > { %v339_v43 = vadd.f32 %v338_v38, %v337_v33  ;;  %v353_v44 = vadd.f32 %v352_v39, %v351_v34  ;;  %v374_v45 = vadd.f32 %v373_v40, %v372_v35  ;;  %v1108_v33 = vpack.c.bf16 %v546_v29, %v544_v28  ;;  %v548_v35 = vld [vmem:[#allocation5 + $0x4a0] sm:$0xff]  ;;  %v555_v38 = vld [vmem:[#allocation5 + $0x4d8] sm:$0xff]  ;;  %v581_v16 = vld [vmem:[#allocation5 + $0x5a8] sm:$0xff] }
  0xe5   : > { %v346_v46 = vadd.f32 %v345_v41, %v344_v36  ;;  %v360_v47 = vadd.f32 %v359_v42, %v358_v37  ;;  %v1110_v34 = vpack.c.bf16 %v551_v31, %v549_v30  ;;  %v550_v36 = vld [vmem:[#allocation5 + $0x4b0] sm:$0xff]  ;;  %v553_v37 = vld [vmem:[#allocation5 + $0x4c8] sm:$0xff]  ;;  %v552_v41 = vld [vmem:[#allocation5 + $0x4c0] sm:$0xff]  ;;  %v1138_v13 = vpack.c.bf16 %v579_v10, %v577_v9 }
  0xe6   : > { %v340_v48 = vrot.slane %v339_v43, 2  ;;  %v354_v49 = vrot.slane %v353_v44, 2  ;;  %v375_v50 = vrot.slane %v374_v45, 2  ;;  %v1112_v39 = vpack.c.bf16 %v550_v36, %v548_v35  ;;  %v554_v42 = vld [vmem:[#allocation5 + $0x4d0] sm:$0xff]  ;;  %v583_v17 = vld [vmem:[#allocation5 + $0x5b8] sm:$0xff]  ;;  %v585_v23 = vld [vmem:[#allocation5 + $0x5c8] sm:$0xff] }
  0xe7   : > { %v347_v51 = vrot.slane %v346_v46, 2  ;;  %v361_v52 = vrot.slane %v360_v47, 2  ;;  %v1114_v40 = vpack.c.bf16 %v555_v38, %v553_v37  ;;  %v1142_v19 = vpack.c.bf16 %v583_v17, %v581_v16  ;;  %v587_v24 = vld [vmem:[#allocation5 + $0x5d8] sm:$0xff]  ;;  %v586_v28 = vld [vmem:[#allocation5 + $0x5d0] sm:$0xff]  ;;  %v589_v30 = vld [vmem:[#allocation5 + $0x5e8] sm:$0xff] }
  0xe8   : > { %v341_v53 = vadd.f32 %v340_v48, %v339_v43  ;;  %v355_v54 = vadd.f32 %v354_v49, %v353_v44  ;;  %v376_v55 = vadd.f32 %v375_v50, %v374_v45  ;;  %v557_v43 = vld [vmem:[#allocation5 + $0x4e8] sm:$0xff]  ;;  %v559_v44 = vld [vmem:[#allocation5 + $0x4f8] sm:$0xff]  ;;  %v1116_v45 = vpack.c.bf16 %v554_v42, %v552_v41  ;;  %v558_v48 = vld [vmem:[#allocation5 + $0x4f0] sm:$0xff] }
  0xe9   : > { %v348_v56 = vadd.f32 %v347_v51, %v346_v46  ;;  %v362_v57 = vadd.f32 %v361_v52, %v360_v47  ;;  %v1118_v46 = vpack.c.bf16 %v559_v44, %v557_v43  ;;  %v556_v47 = vld [vmem:[#allocation5 + $0x4e0] sm:$0xff]  ;;  %v561_v49 = vld [vmem:[#allocation5 + $0x508] sm:$0xff]  ;;  %v563_v50 = vld [vmem:[#allocation5 + $0x518] sm:$0xff]  ;;  %v367_v22 = vadd.f32 %v366_v12, %v1538_v32 }
  0xea   : > { %v342_v58 = vrot.slane %v341_v53, 1  ;;  %v356_v59 = vrot.slane %v355_v54, 1  ;;  %v377_v0 = vrot.slane %v376_v55, 1  ;;  %v1120_v51 = vpack.c.bf16 %v558_v48, %v556_v47  ;;  %v591_v31 = vld [vmem:[#allocation5 + $0x5f8] sm:$0xff]  ;;  %v588_v35 = vld [vmem:[#allocation5 + $0x5e0] sm:$0xff]  ;;  %v590_v36 = vld [vmem:[#allocation5 + $0x5f0] sm:$0xff] }
  0xeb   : > { %v349_v62 = vrot.slane %v348_v56, 1  ;;  %v363_v63 = vrot.slane %v362_v57, 1  ;;  %v1122_v52 = vpack.c.bf16 %v563_v50, %v561_v49  ;;  %v368_v29 = vrot.slane %v367_v22, 2 }
  0xec   : > { %v343_v3 = vadd.f32 %v342_v58, %v341_v53  ;;  %v357_v4 = vadd.f32 %v356_v59, %v355_v54  ;;  %v378_v11 = vadd.f32 %v377_v0, %v376_v55  ;;  %v560_v53 = vld [vmem:[#allocation5 + $0x500] sm:$0xff]  ;;  %v562_v54 = vld [vmem:[#allocation5 + $0x510] sm:$0xff]  ;;  %v565_v55 = vld [vmem:[#allocation5 + $0x528] sm:$0xff]  ;;  %v1152_v32 = vpack.c.bf16 %v590_v36, %v588_v35 }
  0xed   : > { %v350_v5 = vadd.f32 %v349_v62, %v348_v56  ;;  %v364_v6 = vadd.f32 %v363_v63, %v362_v57  ;;  %v567_v56 = vld [vmem:[#allocation5 + $0x538] sm:$0xff]  ;;  %v1124_v57 = vpack.c.bf16 %v562_v54, %v560_v53  ;;  %v564_v59 = vld [vmem:[#allocation5 + $0x520] sm:$0xff]  ;;  %v369_v37 = vadd.f32 %v368_v29, %v367_v22 }
  0xee   : > { %v1126_v58 = vpack.c.bf16 %v567_v56, %v565_v55  ;;  %v571_v62 = vld [vmem:[#allocation5 + $0x558] sm:$0xff]  ;;  %v1128_v63 = vpack.c.bf16 %v566_v60, %v564_v59  ;;  %v807_v42 = vlaneseq  ;;  %v1355_v47 = vmov 1966171168  }
  0xef   : > { %656 = vmatprep.mubr.f32.mxu1 %v350_v5  ;;  %727 = vmatprep.mubr.f32.mxu0 %v364_v6  ;;  %v1130_v0 = vpack.c.bf16 %v571_v62, %v569_v61  ;;  %v1132_v5 = vpack.c.bf16 %v570_v2, %v568_v1  ;;  %v370_v38 = vrot.slane %v369_v37, 1  ;;  %v825_v48 = vunpack.c.l.s4 %v1355_v47 }
  0xf0   : > { %657 = vmatmul.mubr.f32.vlgmr.msra.gmra.mrb[0].mxu1 %v343_v3  ;;  %728 = vmatmul.mubr.f32.vlgmr.msra.gmra.mrb[0].mxu0 %v357_v4  ;;  %v573_v3 = vld [vmem:[#allocation5 + $0x568] sm:$0xff]  ;;  %v575_v4 = vld [vmem:[#allocation5 + $0x578] sm:$0xff]  ;;  %v808_v43 = vshrl.u32 %v807_v42, 7  ;;  %vm841_vm0 = vcmp.lt.s32.totalorder %v807_v42, 256 }
  0xf1   : > { %1093 = vmatpush1.bf16.msra.mxu0 %v1092_v7  ;;  %798 = vmatprep.mubr.f32.mxu0 %v378_v11  ;;  %v1134_v6 = vpack.c.bf16 %v575_v4, %v573_v3  ;;  %v572_v7 = vld [vmem:[#allocation5 + $0x560] sm:$0xff]  ;;  %v826_v55 = vunpack.c.0.s8 %v825_v48 }
  0xf2   : > { %1095 = vmatprep.subr.bf16.mxu0 %v1094_v8  ;;  %v574_v8 = vld [vmem:[#allocation5 + $0x570] sm:$0xff]  ;;  %v809_v44 = vsub.s32 0, %v808_v43 }
  0xf3   : > { %v1136_v11 = vpack.c.bf16 %v574_v8, %v572_v7  ;;  %v829_v60 = vsub.s32 %v826_v55, %v808_v43 }
  0xf5   : > { %1097 = vmatpush1.bf16.msra.mxu0 %v1096_v14  ;;  %v576_v14 = vld [vmem:[#allocation5 + $0x580] sm:$0xff] }
  0xf6   : > { %1099 = vmatprep.subr.bf16.mxu0 %v1098_v15  ;;  %v578_v15 = vld [vmem:[#allocation5 + $0x590] sm:$0xff] }
  0xf7   : > { %v1140_v18 = vpack.c.bf16 %v578_v15, %v576_v14 }
  0xf9   : > { %1101 = vmatpush1.bf16.msra.mxu0 %v1100_v20  ;;  %v580_v20 = vld [vmem:[#allocation5 + $0x5a0] sm:$0xff] }
  0xfa   : > { %1103 = vmatprep.subr.bf16.mxu0 %v1102_v21  ;;  %v582_v21 = vld [vmem:[#allocation5 + $0x5b0] sm:$0xff] }
  0xfb   : > { %v1144_v25 = vpack.c.bf16 %v582_v21, %v580_v20 }
  0xfd   : > { %1105 = vmatpush1.bf16.msra.mxu0 %v1104_v26  ;;  %v1146_v26 = vpack.c.bf16 %v587_v24, %v585_v23 }
  0xfe   : > { %1107 = vmatprep.subr.bf16.mxu0 %v1106_v27  ;;  %v584_v27 = vld [vmem:[#allocation5 + $0x5c0] sm:$0xff] }
 0x101   : > { %1109 = vmatpush1.bf16.msra.mxu0 %v1108_v33  ;;  %v1148_v33 = vpack.c.bf16 %v586_v28, %v584_v27 }
 0x102   : > { %1111 = vmatprep.subr.bf16.mxu0 %v1110_v34  ;;  %v1150_v34 = vpack.c.bf16 %v591_v31, %v589_v30 }
 0x105   : > { %1113 = vmatpush1.bf16.msra.mxu0 %v1112_v39  ;;  %v371_v39 = vadd.f32 %v370_v38, %v369_v37 }
 0x106   : > { %1115 = vmatprep.subr.bf16.mxu0 %v1114_v40 }
 0x109   : > { %1117 = vmatpush1.bf16.msra.mxu0 %v1116_v45  ;;  %v805_v45 = vld [vmem:[%s1570_s3] sm:$0x3] }
 0x10a   : > { %1119 = vmatprep.subr.bf16.mxu0 %v1118_v46  ;;  %v813_v46 = vsub.s32 1, %v808_v43  ;;  %v810_v49 = vrot.slane %v805_v45, %v809_v44 }
 0x10d   : > { %1121 = vmatpush1.bf16.msra.mxu0 %v1120_v51  ;;  %v814_v51 = vrot.slane %v805_v45, %v813_v46 }
 0x10e   : > { %1123 = vmatprep.subr.bf16.mxu0 %v1122_v52 }
 0x111   : > { %1125 = vmatpush1.bf16.msra.mxu0 %v1124_v57 }
 0x112   : > { %1127 = vmatprep.subr.bf16.mxu0 %v1126_v58 }
 0x115   : > { %1129 = vmatpush1.bf16.msra.mxu0 %v1128_v63 }
 0x116   : > { %1131 = vmatprep.subr.bf16.mxu0 %v1130_v0 }
 0x119   : > { %1133 = vmatpush1.bf16.msra.mxu0 %v1132_v5 }
 0x11a   : > { %1135 = vmatprep.subr.bf16.mxu0 %v1134_v6 }
 0x11d   : > { %1137 = vmatpush1.bf16.msra.mxu0 %v1136_v11 }
 0x11e   : > { %1139 = vmatprep.subr.bf16.mxu0 %v1138_v13 }
 0x121   : > { %1141 = vmatpush1.bf16.msra.mxu0 %v1140_v18 }
 0x122   : > { %1143 = vmatprep.subr.bf16.mxu0 %v1142_v19 }
 0x125   : > { %1145 = vmatpush1.bf16.msra.mxu0 %v1144_v25 }
 0x126   : > { %1147 = vmatprep.subr.bf16.mxu0 %v1146_v26 }
 0x129   : > { %1149 = vmatpush1.bf16.msra.mxu0 %v1148_v33 }
 0x12a   : > { %1151 = vmatprep.subr.bf16.mxu0 %v1150_v34 }
 0x12d   : > { %1153 = vmatpush1.bf16.msra.mxu0 %v1152_v32 }
 0x130   : > { %799 = vmatmul.mubr.f32.vlgmr.msra.gmra.mrb[0].mxu0 %v371_v39 }
 0x1c3   : > { %v658_v40 = vpop.f32.mrb[0].mxu1 }
 0x1c4   : > { %v660_v41 = vpop.f32.mrb[1].mxu1 }
 0x203   : > { %v800_v50 = vpop.f32.mrb[0].mxu0 }
 0x204   : > { %v1154_v52 = vadd.f32 %v800_v50, %v658_v40  ;;  %v802_v53 = vpop.f32.mrb[1].mxu0 }
 0x205   : > { %v1155_v54 = vadd.f32 %v802_v53, %v660_v41 }
 0x206   : > { %v817_v56 = vadd.f32 %v1154_v52, %v810_v49 }
 0x207   : > { %v818_v57 = vadd.f32 %v1155_v54, %v814_v51 }
 0x208   : > { %v819_v58 = vmax.f32 %v817_v56, 0.0 }
 0x209   : > { %v820_v59 = vmax.f32 %v818_v57, 0.0 }
 0x20b   : > { %v823_v61 = vcombine.low %v819_v58, %v820_v59 }
 0x20d   : > { %v830_v62 = vrot.slane %v823_v61, %v829_v60 }
 0x20f   : > { %v837_v63 = vrot.slane %v830_v62, %v829_v60 }
 0x211   : > { %843 = vst.msk [vmem:[%s284_s25] sm:$0x3] %vm841_vm0, %v837_v63 }
 0x212 PF: > { %s18_s20 = sadd.s32 1, %s1346_s20   ;;  %s1584_s15 = smov %s1330_s16 }
 0x213   : > { %p15_p1 = scmp.ge.s32.totalorder %s18_s20, 4   ;;  %s1585_s16 = smov %s1334_s17 }
 0x214   : > { %s1586_s17 = smov %s1467_s26  ;;  %s1587_s18 = smov %s1342_s19 }
 0x215   : > { %s1588_s19 = smov %s1590_s28  ;;  %17 = sbr.rel (!%p15_p1) target bundleno = 5 (0x5), region = 91 }
 0x21c   :  { %863 = vsyncpa [#allocation4], 1 }
 0x21d   :  { %865 = vsyncpa [#allocation4 + $0x1], 1 }
 0x21e   :  { %866 = vsyncpa [#allocation6], 1 }

</bundles_post_ra>
